<compile_context>
chip_gen: v5e
topology: v5e:2x2
jax: 0.10.0
libtpu: 0.0.40
codegen_flags: <defaults>
</compile_context>

<pallas_src>
import functools

import jax
import jax.numpy as jnp
import numpy as np
from jax.experimental import pallas as pl
from jax.experimental.pallas import tpu as pltpu


def _round_up(v, m):
    return ((v + m - 1) // m) * m


def _vmem_capacity_bytes():
    try:
        return int(pltpu.get_tpu_info().vmem_capacity_bytes)
    except Exception:
        return 64 * 1024 * 1024     # conservative fallback (v7x per-TensorCore)


# --------------------------- kernels ---------------------------------------


def _project_kernel(x_ref, w1_ref, dinv_ref, xw_ref):
    # xw_scaled = (x @ W1) * dinv_row  -- folds the "column" side of the
    # symmetric normalization so the aggregation consumes raw adjacency.
    xw_ref[...] = jnp.dot(x_ref[...], w1_ref[...],
                          preferred_element_type=jnp.float32,
                          precision=jax.lax.Precision.HIGHEST) * dinv_ref[...]


def _gcn_agg_kernel(adj_ref, dinv_r_ref, xw_ref, b1_ref, w2_ref, b2_ref,
                    out_ref, acc_ref, *, tk, xw_resident):
    k = pl.program_id(1)

    @pl.when(k == 0)
    def _():
        acc_ref[...] = jnp.zeros_like(acc_ref)

    if xw_resident:
        start = pl.multiple_of(k * tk, tk)
        xw_blk = xw_ref[pl.ds(start, tk), :]
    else:
        xw_blk = xw_ref[...]

    # adj holds raw (A + I) edge counts in storage dtype (bf16 by default);
    # only a widening cast per tile -- normalization already folded out.
    acc_ref[...] += jnp.dot(adj_ref[...].astype(jnp.float32), xw_blk,
                            preferred_element_type=jnp.float32,
                            precision=jax.lax.Precision.HIGHEST)

    @pl.when(k == pl.num_programs(1) - 1)
    def _():
        # Row-side D^-1/2, GCN bias, ReLU, then the fused fc layer.
        h = jnp.maximum(dinv_r_ref[...] * acc_ref[...] + b1_ref[...], 0.0)
        out_ref[...] = jnp.dot(h, w2_ref[...],
                               preferred_element_type=jnp.float32,
                               precision=jax.lax.Precision.HIGHEST) + b2_ref[...]


# --------------------------- wrapper ----------------------------------------


def very_simplified_gnn(x, edge_index, w1, b1, w2, b2, *,
                        adj_dtype=jnp.bfloat16):
    """x: [N, F] float32, edge_index: [2, E] int32 (row 0 = src, row 1 = dst).

    adj_dtype: bf16 default (exact for per-edge multiplicities <= 256, halves the
    dominant HBM stream).  Set jnp.float32 for pathological multi-graphs.
    """
    n, f = x.shape
    hidden = w1.shape[1]
    c = w2.shape[1]
    adj_itemsize = int(np.dtype(adj_dtype).itemsize)

    vmem_cap = _vmem_capacity_bytes()
    big_vmem = vmem_cap >= 100 * 1024 * 1024      # v5e/v6e (128 MiB) vs v7x (64 MiB)

    # ---- tile selection -----------------------------------------------------
    TM = 1024
    if adj_itemsize <= 2:
        TK = 4096 if big_vmem else 2048
    else:
        TK = 2048 if big_vmem else 1024

    if n <= TM:
        npad = _round_up(n, 128)
        # Split the row axis in two when possible so the "parallel" grid axis
        # still feeds both of v7x's TensorCores on mid-sized graphs.
        tm = npad if npad <= 128 else npad // 2
        tk = npad
    else:
        npad = _round_up(n, TM)
        tm = TM
        tk = TM
        while tk * 2 <= TK and npad % (tk * 2) == 0:
            tk *= 2
    nb_r = npad // tm
    nb_k = npad // tk
    cpad = _round_up(c, 128)          # lane-dense output slab

    # xw is only npad x 16 f32, but lane-pads to 128 wide in VMEM: keep it fully
    # resident (no re-streaming per row tile) while that stays small.
    xw_resident = npad <= 8192

    # ---- glue (plain JAX): raw adjacency with self-loops + O(E) degree -----
    # TODO(synk): for truly sparse graphs (E << N^2) a CSR scalar-prefetch
    # gather kernel would beat this dense formulation; dense kept per spec.
    src = edge_index[0]
    dst = edge_index[1]
    self_idx = jnp.arange(n, dtype=edge_index.dtype)
    src = jnp.concatenate([src, self_idx])
    dst = jnp.concatenate([dst, self_idx])

    # A[dst, src] accumulates 1 per edge (duplicates add), matching PyG.
    # Scattered directly into the storage dtype (no N^2 cast pass).
    ones = jnp.ones(src.shape, dtype=adj_dtype)
    adj = jnp.zeros((npad, npad), dtype=adj_dtype).at[dst, src].add(ones)

    # O(E) in-degree (incl. self loop) instead of an O(N^2) row reduction.
    deg = jnp.zeros((npad,), jnp.float32).at[dst].add(1.0)
    dinv = jnp.where(deg > 0, jax.lax.rsqrt(deg), 0.0)
    dinv_col = dinv.reshape(npad, 1)

    x_p = jnp.zeros((npad, f), x.dtype).at[:n, :].set(x)
    b1_2d = b1.reshape(1, hidden).astype(jnp.float32)
    w2_p = jnp.zeros((hidden, cpad), jnp.float32).at[:, :c].set(w2)
    b2_p = jnp.zeros((1, cpad), jnp.float32).at[0, :c].set(b2)

    # ---- kernel 1: scaled feature projection xw = dinv * (x @ W1) ----------
    xw = pl.pallas_call(
        _project_kernel,
        out_shape=jax.ShapeDtypeStruct((npad, hidden), jnp.float32),
        grid=(nb_r,),
        in_specs=[
            pl.BlockSpec((tm, f), lambda i: (i, 0)),
            pl.BlockSpec((f, hidden), lambda i: (0, 0)),
            pl.BlockSpec((tm, 1), lambda i: (i, 0)),
        ],
        out_specs=pl.BlockSpec((tm, hidden), lambda i: (i, 0)),
        compiler_params=pltpu.CompilerParams(
            dimension_semantics=("parallel",)),
    )(x_p, w1.astype(jnp.float32), dinv_col)

    # ---- kernel 2: tiled raw aggregation + row scale + bias + ReLU + fc ----
    if xw_resident:
        xw_spec = pl.BlockSpec((npad, hidden), lambda i, k: (0, 0))
    else:
        xw_spec = pl.BlockSpec((tk, hidden), lambda i, k: (k, 0))

    # VMEM budget (narrow dims lane-pad to 128) -> explicit scoped limit so the
    # larger tiles aren't rejected by the 16/32 MiB defaults.
    est = (2 * tm * tk * adj_itemsize                         # adj double buffer
           + (tm * tk * 4 if adj_itemsize < 4 else 0)         # f32 upcast temp
           + (2 * npad if xw_resident else 2 * tk) * 128 * 4  # xw buffers (padded)
           + 2 * tm * cpad * 4                                # out double buffer
           + tm * 128 * 4                                     # f32 accumulator
           + 2 * tm * 128 * 4                                 # dinv row blocks
           + 8 * 1024 * 1024)                                 # weights + headroom
    vmem_limit = int(min(max(est, 32 * 1024 * 1024),
                         vmem_cap - 8 * 1024 * 1024))

    flops = 2 * npad * npad * hidden + 2 * npad * hidden * cpad
    xw_bytes = npad * hidden * 4 * (1 if xw_resident else nb_r)
    bytes_accessed = (npad * npad * adj_itemsize     # adj stream (dominant)
                      + xw_bytes                     # xw (resident or re-streamed)
                      + npad * cpad * 4              # output writeback
                      + npad * 4)                    # dinv

    kernel = functools.partial(_gcn_agg_kernel, tk=tk, xw_resident=xw_resident)
    out_padded = pl.pallas_call(
        kernel,
        out_shape=jax.ShapeDtypeStruct((npad, cpad), jnp.float32),
        grid=(nb_r, nb_k),                                  # reduction axis last
        in_specs=[
            pl.BlockSpec((tm, tk), lambda i, k: (i, k)),        # raw adj tile
            pl.BlockSpec((tm, 1), lambda i, k: (i, 0)),         # dinv rows (finalize)
            xw_spec,                                            # scaled xw
            pl.BlockSpec((1, hidden), lambda i, k: (0, 0)),     # b1
            pl.BlockSpec((hidden, cpad), lambda i, k: (0, 0)),  # W2 (lane-padded)
            pl.BlockSpec((1, cpad), lambda i, k: (0, 0)),       # b2 (lane-padded)
        ],
        out_specs=pl.BlockSpec((tm, cpad), lambda i, k: (i, 0)),
        scratch_shapes=[pltpu.VMEM((tm, hidden), jnp.float32)],
        compiler_params=pltpu.CompilerParams(
            dimension_semantics=("parallel", "arbitrary"),
            vmem_limit_bytes=vmem_limit),
        cost_estimate=pl.CostEstimate(
            flops=flops, transcendentals=0, bytes_accessed=bytes_accessed),
    )(adj, dinv_col, xw, b1_2d, w2_p, b2_p)

    return out_padded[:n, :c]


# --------------------------- reference & test --------------------------------


def _reference(x, edge_index, w1, b1, w2, b2):
    n = x.shape[0]
    src = edge_index[0]
    dst = edge_index[1]
    self_idx = jnp.arange(n, dtype=edge_index.dtype)
    src = jnp.concatenate([src, self_idx])
    dst = jnp.concatenate([dst, self_idx])
    adj = jnp.zeros((n, n), dtype=jnp.float32).at[dst, src].add(1.0)
    deg = jnp.sum(adj, axis=1)
    dinv = jnp.where(deg > 0, jax.lax.rsqrt(deg), 0.0)
    adj_hat = dinv[:, None] * adj * dinv[None, :]
    xw = jnp.dot(x, w1, precision=jax.lax.Precision.HIGHEST)
    h = jnp.maximum(jnp.dot(adj_hat, xw, precision=jax.lax.Precision.HIGHEST) + b1, 0.0)
    return jnp.dot(h, w2, precision=jax.lax.Precision.HIGHEST) + b2


if __name__ == "__main__":
    N = 128            # number of graph nodes
    NUM_FEATURES = 32
    HIDDEN = 16        # fixed by the module (GCNConv(num_features, 16))
    NUM_CLASSES = 8
    E = 512            # number of edges

    key = jax.random.PRNGKey(0)
    kx, ke, kw1, kb1, kw2, kb2 = jax.random.split(key, 6)

    x = jax.random.normal(kx, (N, NUM_FEATURES), dtype=jnp.float32)
    edge_index = jax.random.randint(ke, (2, E), 0, N, dtype=jnp.int32)

    w1 = jax.random.normal(kw1, (NUM_FEATURES, HIDDEN), dtype=jnp.float32) * 0.1
    b1 = jax.random.normal(kb1, (HIDDEN,), dtype=jnp.float32) * 0.1
    w2 = jax.random.normal(kw2, (HIDDEN, NUM_CLASSES), dtype=jnp.float32) * 0.1
    b2 = jax.random.normal(kb2, (NUM_CLASSES,), dtype=jnp.float32) * 0.1

    out = very_simplified_gnn(x, edge_index, w1, b1, w2, b2)
    out = jax.block_until_ready(out)

    ref = _reference(x, edge_index, w1, b1, w2, b2)
    assert out.shape == (N, NUM_CLASSES)
    assert jnp.allclose(out, ref, atol=1e-4, rtol=1e-4)

    print("KERNEL_OK")
</pallas_src>

<mosaic_0001>
module attributes {stable_mosaic.version = 11 : i64} {
  func.func @_project_kernel(%arg0: i32, %arg1: memref<128x32xf32, #tpu.memory_space<vmem>>, %arg2: memref<32x16xf32, #tpu.memory_space<vmem>>, %arg3: memref<128x1xf32, #tpu.memory_space<vmem>>, %arg4: memref<128x16xf32, #tpu.memory_space<vmem>>) attributes {dimension_semantics = [#tpu.dimension_semantics<parallel>], iteration_bounds = array<i64: 1>, scalar_prefetch = 0 : i64, scratch_operands = 0 : i64, tpu.core_type = #tpu.core_type<tc>, window_params = [{transform_indices = @transform_0, window_bounds = array<i64: 128, 32>}, {pipeline_mode = #tpu.pipeline_mode<synchronous>, transform_indices = @transform_1, window_bounds = array<i64: 32, 16>}, {transform_indices = @transform_2, window_bounds = array<i64: 128, 1>}, {transform_indices = @transform_3, window_bounds = array<i64: 128, 16>}]} {
    %c0 = arith.constant 0 : index
    %c0_0 = arith.constant 0 : index
    %0 = vector.load %arg1[%c0, %c0_0] : memref<128x32xf32, #tpu.memory_space<vmem>>, vector<128x32xf32>
    %c0_1 = arith.constant 0 : index
    %c0_2 = arith.constant 0 : index
    %1 = vector.load %arg2[%c0_1, %c0_2] : memref<32x16xf32, #tpu.memory_space<vmem>>, vector<32x16xf32>
    %cst = arith.constant dense<0.000000e+00> : vector<128x16xf32>
    %2 = tpu.matmul %0, %1, %cst {dimension_numbers = #tpu.dot_dimension_numbers<[1], [0], [0], [1], [0, 0, 1, 1], [], []>, precision = #tpu.contract_precision<fp32>} : vector<128x32xf32>, vector<32x16xf32>, vector<128x16xf32> -> vector<128x16xf32>
    %c0_3 = arith.constant 0 : index
    %c0_4 = arith.constant 0 : index
    %3 = vector.load %arg3[%c0_3, %c0_4] : memref<128x1xf32, #tpu.memory_space<vmem>>, vector<128x1xf32>
    %4 = vector.broadcast %3 : vector<128x1xf32> to vector<128x16xf32>
    %5 = arith.mulf %2, %4 : vector<128x16xf32>
    %c0_5 = arith.constant 0 : index
    %c0_6 = arith.constant 0 : index
    %6 = vector.load %arg4[%c0_5, %c0_6] : memref<128x16xf32, #tpu.memory_space<vmem>>, vector<128x16xf32>
    tpu.vector_store %arg4[%c0_5, %c0_6], %5 {strides = array<i32>} : memref<128x16xf32, #tpu.memory_space<vmem>>, vector<128x16xf32>,
    return
  }
  func.func @transform_0(%arg0: i32) -> (i32, i32) {
    %c0_i32 = arith.constant 0 : i32
    %c0_i32_0 = arith.constant 0 : i32
    return %arg0, %c0_i32 : i32, i32
  }
  func.func @transform_1(%arg0: i32) -> (i32, i32) {
    %c0_i32 = arith.constant 0 : i32
    %c0_i32_0 = arith.constant 0 : i32
    %c0_i32_1 = arith.constant 0 : i32
    return %c0_i32, %c0_i32_0 : i32, i32
  }
  func.func @transform_2(%arg0: i32) -> (i32, i32) {
    %c0_i32 = arith.constant 0 : i32
    %c0_i32_0 = arith.constant 0 : i32
    return %arg0, %c0_i32 : i32, i32
  }
  func.func @transform_3(%arg0: i32) -> (i32, i32) {
    %c0_i32 = arith.constant 0 : i32
    %c0_i32_0 = arith.constant 0 : i32
    return %arg0, %c0_i32 : i32, i32
  }
}

</mosaic_0001>

<bundles_post_ra>
// kernel: tpu_custom_call.1
= control target key start
LH: loop header
LB: loop body
LE: loop exit
PB: predicated region body
PF: predicated region fallthrough
CT: control target
= control target key end

     0   :  { %vm34_vm0 = vcmask 261120   ;;  %vm845_vm1 = vcmask 130048   ;;  %s1436_s1 = inlined_call_operand.vmem [shape: f32[32,16], index: 1, kind: input, shape index: {}]   ;;  %s1437_s0 = inlined_call_operand.vmem [shape: f32[128,32], index: 0, kind: input, shape index: {}]   ;;  %s1438_s2 = inlined_call_operand.vmem [shape: f32[128,1], index: 2, kind: input, shape index: {}]   ;;  %s1439_s3 = inlined_call_operand.vmem [shape: f32[128,16], index: 3, kind: output, shape index: {}]  }
   0x1   :  { %v33_v0 = vld [vmem:[%s1436_s1 + $0x18] sm:$0xff]  ;;  %v32_v1 = vld [vmem:[%s1436_s1 + $0x10] sm:$0xff]  ;;  %v31_v2 = vld [vmem:[%s1436_s1 + $0x8] sm:$0xff] }
   0x2   :  { %v908_v3 = vand.u32 4294901760, %v33_v0  ;;  %v910_v4 = vand.u32 4294901760, %v32_v1  ;;  %v912_v5 = vand.u32 4294901760, %v31_v2  ;;  %v30_v6 = vld [vmem:[%s1436_s1] sm:$0xff]  ;;  %v23_v8 = vld [vmem:[%s1437_s0 + $0x48] sm:$0xff]  ;;  %v24_v13 = vld [vmem:[%s1437_s0 + $0x50] sm:$0xff] }
   0x3   :  { %v22_v7 = vld [vmem:[%s1437_s0 + $0x40] sm:$0xff]  ;;  %v923_v9 = vand.u32 4294901760, %v30_v6  ;;  %v63_v11 = vsel %vm34_vm0, %v23_v8, 0  ;;  %v66_v21 = vsel %vm34_vm0, %v24_v13, 0  ;;  %v15_v36 = vld [vmem:[%s1437_s0 + $0x8] sm:$0xff]  ;;  %v16_v37 = vld [vmem:[%s1437_s0 + $0x10] sm:$0xff] }
   0x4   :  { %v60_v10 = vsel %vm34_vm0, %v22_v7, 0  ;;  %v14_v12 = vld [vmem:[%s1437_s0] sm:$0xff]  ;;  %866 = vmatpush.msra.mxu2 %v908_v3  ;;  %v245_v14 = vsub.f32 %v33_v0, %v908_v3  ;;  %v251_v16 = vsub.f32 %v32_v1, %v910_v4  ;;  %v257_v17 = vsub.f32 %v31_v2, %v912_v5  ;;  %96 = vmatpush.msra.mxu0 %v908_v3  ;;  %v25_v46 = vld [vmem:[%s1437_s0 + $0x58] sm:$0xff] }
   0x5   :  { %v935_v15 = vand.u32 4294901760, %v60_v10  ;;  %v941_v18 = vsub.f32 %v30_v6, %v923_v9  ;;  %v943_v19 = vand.u32 4294901760, %v63_v11  ;;  %v36_v20 = vsel %vm34_vm0, %v14_v12, 0  ;;  %v17_v57 = vld [vmem:[%s1437_s0 + $0x18] sm:$0xff]  ;;  %v26_v1 = vld [vmem:[%s1437_s0 + $0x60] sm:$0xff] }
   0x6   :  { %867 = vmatpush.msra.mxu2 %v910_v4  ;;  %v246_v22 = vand.u32 4294901760, %v245_v14  ;;  %v252_v24 = vand.u32 4294901760, %v251_v16  ;;  %v258_v25 = vand.u32 4294901760, %v257_v17  ;;  %98 = vmatpush.msra.mxu0 %v910_v4  ;;  %v956_v28 = vand.u32 4294901760, %v36_v20 }
   0x7   :  { %v949_v23 = vsub.f32 %v60_v10, %v935_v15  ;;  %v264_v26 = vand.u32 4294901760, %v941_v18  ;;  %v954_v27 = vsub.f32 %v63_v11, %v943_v19  ;;  %v967_v35 = vand.u32 4294901760, %v66_v21  ;;  %v18_v11 = vld [vmem:[%s1437_s0 + $0x20] sm:$0xff] }
   0x8   :  { %868 = vmatpush.msra.mxu2 %v912_v5  ;;  %v247_v29 = vsub.f32 %v245_v14, %v246_v22  ;;  %v253_v31 = vsub.f32 %v251_v16, %v252_v24  ;;  %v259_v32 = vsub.f32 %v257_v17, %v258_v25  ;;  %100 = vmatpush.msra.mxu0 %v912_v5  ;;  %v39_v45 = vsel %vm34_vm0, %v15_v36, 0 }
   0x9   :  { %v169_v30 = vand.u32 4294901760, %v949_v23  ;;  %v265_v33 = vsub.f32 %v941_v18, %v264_v26  ;;  %v965_v34 = vsub.f32 %v36_v20, %v956_v28  ;;  %v177_v41 = vand.u32 4294901760, %v954_v27 }
   0xa   :  { %869 = vmatpush.msra.mxu2 %v923_v9  ;;  %v248_v38 = vand.u32 4294901760, %v247_v29  ;;  %v254_v40 = vand.u32 4294901760, %v253_v31  ;;  %102 = vmatpush.msra.mxu0 %v923_v9  ;;  %v260_v44 = vand.u32 4294901760, %v259_v32  ;;  %v42_v47 = vsel %vm34_vm0, %v16_v37, 0  ;;  %v28_v37 = vld [vmem:[%s1437_s0 + $0x70] sm:$0xff] }
   0xb   :  { %v170_v39 = vsub.f32 %v949_v23, %v169_v30  ;;  %v105_v42 = vand.u32 4294901760, %v965_v34  ;;  %v990_v49 = vand.u32 4294901760, %v39_v45  ;;  %v266_v50 = vand.u32 4294901760, %v265_v33 }
   0xc   :  { %347 = vmatpush.msrb.mxu2 %v245_v14  ;;  %570 = vmatpush.msrb.mxu0 %v246_v22  ;;  %v178_v51 = vsub.f32 %v954_v27, %v177_v41  ;;  %v996_v52 = vsub.f32 %v66_v21, %v967_v35  ;;  %v998_v53 = vand.u32 4294901760, %v42_v47  ;;  %v69_v56 = vsel %vm34_vm0, %v25_v46, 0  ;;  %v20_v46 = vld [vmem:[%s1437_s0 + $0x30] sm:$0xff] }
   0xd   :  { %870 = vmatpush.msra.mxu3 %v248_v38  ;;  %v171_v43 = vand.u32 4294901760, %v170_v39  ;;  %249 = vmatpush.msra.mxu1 %v248_v38  ;;  %v106_v48 = vsub.f32 %v965_v34, %v105_v42  ;;  %v1001_v55 = vsub.f32 %v39_v45, %v990_v49  ;;  %v1012_v62 = vand.u32 4294901760, %v69_v56 }
   0xe   :  { %350 = vmatpush.msrb.mxu2 %v251_v16  ;;  %574 = vmatpush.msrb.mxu0 %v252_v24  ;;  %v1009_v59 = vsub.f32 %v42_v47, %v998_v53  ;;  %v179_v60 = vand.u32 4294901760, %v178_v51  ;;  %v185_v61 = vand.u32 4294901760, %v996_v52  ;;  %v45_v63 = vsel %vm34_vm0, %v17_v57, 0  ;;  %v29_v57 = vld [vmem:[%s1437_s0 + $0x78] sm:$0xff] }
   0xf   :  { %172 = vmatmul.f32.vlgmr.msra.gmra.mxu2 %v171_v43  ;;  %871 = vmatpush.msra.mxu3 %v254_v40  ;;  %v107_v54 = vand.u32 4294901760, %v106_v48  ;;  %v113_v58 = vand.u32 4294901760, %v1001_v55  ;;  %v1027_v7 = vand.u32 4294901760, %v45_v63  ;;  %v1036_v10 = vsub.f32 %v69_v56, %v1012_v62 }
  0x10   :  { %255 = vmatpush.msra.mxu1 %v254_v40  ;;  %353 = vmatpush.msrb.mxu2 %v257_v17  ;;  %v121_v6 = vand.u32 4294901760, %v1009_v59  ;;  %v186_v8 = vsub.f32 %v996_v52, %v185_v61  ;;  %v48_v17 = vsel %vm34_vm0, %v18_v11, 0  ;;  %v78_v45 = vsel %vm34_vm0, %v28_v37, 0 }
  0x11   :  { %872 = vmatpush.msra.mxu3 %v260_v44  ;;  %578 = vmatpush.msrb.mxu0 %v258_v25  ;;  %v114_v0 = vsub.f32 %v1001_v55, %v113_v58  ;;  %v1048_v13 = vsub.f32 %v45_v63, %v1027_v7  ;;  %v193_v16 = vand.u32 4294901760, %v1036_v10  ;;  %v1063_v21 = vand.u32 4294901760, %v48_v17  ;;  %v19_v25 = vld [vmem:[%s1437_s0 + $0x28] sm:$0xff] }
  0x12   :  { %261 = vmatpush.msra.mxu1 %v260_v44  ;;  %108 = vmatmul.f32.vlgmr.msra.gmra.mxu0 %v107_v54  ;;  %v122_v12 = vsub.f32 %v1009_v59, %v121_v6  ;;  %v187_v14 = vand.u32 4294901760, %v186_v8  ;;  %v51_v36 = vsel %vm34_vm0, %v19_v25, 0  ;;  %v1110_v54 = vand.u32 4294901760, %v78_v45 }
  0x13   :  { %873 = vmatpush.msra.mxu3 %v266_v50  ;;  %356 = vmatpush.msrb.mxu2 %v941_v18  ;;  %v115_v2 = vand.u32 4294901760, %v114_v0  ;;  %v27_v18 = vld [vmem:[%s1437_s0 + $0x68] sm:$0xff]  ;;  %v129_v20 = vand.u32 4294901760, %v1048_v13  ;;  %v194_v22 = vsub.f32 %v1036_v10, %v193_v16  ;;  %v1079_v29 = vsub.f32 %v48_v17, %v1063_v21 }
  0x14   :  { %301 = vmatmul.f32.vlgmr.msra.gmra.mxu3 %v935_v15  ;;  %267 = vmatpush.msra.mxu1 %v266_v50  ;;  %v1091_v40 = vand.u32 4294901760, %v51_v36  ;;  %v54_v56 = vsel %vm34_vm0, %v20_v46, 0  ;;  %v81_v8 = vsel %vm34_vm0, %v29_v57, 0 }
  0x15   :  { %451 = vmatpush.msrb.mxu3 %v908_v3  ;;  %269 = vmatmul.f32.vlgmr.msra.gmra.mxu1 %v956_v28  ;;  %v195_v31 = vand.u32 4294901760, %v194_v22  ;;  %v137_v39 = vand.u32 4294901760, %v1079_v29  ;;  %v1119_v0 = vand.u32 4294901760, %v54_v56 }
  0x16   :  { %661 = vmatpush.msrb.mxu1 %v908_v3  ;;  %582 = vmatpush.msrb.mxu0 %v264_v26  ;;  %v72_v3 = vsel %vm34_vm0, %v26_v1, 0  ;;  %v130_v26 = vsub.f32 %v1048_v13, %v129_v20  ;;  %v1107_v48 = vsub.f32 %v51_v36, %v1091_v40 }
  0x17   :  { %180 = vmatmul.f32.gmra.mxu2 %v179_v60  ;;  %453 = vmatpush.msrb.mxu3 %v910_v4  ;;  %v138_v47 = vsub.f32 %v1079_v29, %v137_v39 }
  0x18   :  { %663 = vmatpush.msrb.mxu1 %v910_v4  ;;  %v1052_v4 = vand.u32 4294901760, %v72_v3  ;;  %v131_v38 = vand.u32 4294901760, %v130_v26  ;;  %v145_v63 = vand.u32 4294901760, %v1107_v48 }
  0x19   :  { %455 = vmatpush.msrb.mxu3 %v912_v5  ;;  %v139_v60 = vand.u32 4294901760, %v138_v47 }
  0x1a   :  { %116 = vmatmul.f32.gmra.mxu0 %v115_v2  ;;  %665 = vmatpush.msrb.mxu1 %v912_v5  ;;  %v123_v5 = vand.u32 4294901760, %v122_v12  ;;  %v1069_v24 = vsub.f32 %v72_v3, %v1052_v4  ;;  %v1125_v2 = vsub.f32 %v78_v45, %v1110_v54  ;;  %v21_v3 = vld [vmem:[%s1437_s0 + $0x38] sm:$0xff]  ;;  %v146_v11 = vsub.f32 %v1107_v48, %v145_v63 }
  0x1b   :  { %457 = vmatpush.msrb.mxu3 %v923_v9  ;;  %v1135_v12 = vsub.f32 %v54_v56, %v1119_v0 }
  0x1c   :  { %305 = vmatmul.f32.gmra.mxu3 %v943_v19  ;;  %667 = vmatpush.msrb.mxu1 %v923_v9  ;;  %v75_v9 = vsel %vm34_vm0, %v27_v18, 0  ;;  %v201_v32 = vand.u32 4294901760, %v1069_v24  ;;  %v217_v17 = vand.u32 4294901760, %v1125_v2  ;;  %v1138_v18 = vand.u32 4294901760, %v81_v8 }
  0x1d   :  { %273 = vmatmul.f32.gmra.mxu1 %v990_v49  ;;  %v1082_v33 = vand.u32 4294901760, %v75_v9  ;;  %v147_v22 = vand.u32 4294901760, %v146_v11  ;;  %v741_v11 = vld [vmem:[%s1438_s2 + $0x40] sm:$0xff] }
  0x1e   :  { %v202_v43 = vsub.f32 %v1069_v24, %v201_v32  ;;  %v218_v26 = vsub.f32 %v1125_v2, %v217_v17 }
  0x1f   :  { %188 = vmatmul.f32.gmra.mxu2 %v187_v14  ;;  %v1097_v44 = vsub.f32 %v75_v9, %v1082_v33  ;;  %v153_v9 = vand.u32 4294901760, %v1135_v12 }
  0x20   :  { %v203_v50 = vand.u32 4294901760, %v202_v43 }
  0x21   :  { %v209_v51 = vand.u32 4294901760, %v1097_v44  ;;  %v154_v36 = vsub.f32 %v1135_v12, %v153_v9 }
  0x22   :  { %124 = vmatmul.f32.gmra.mxu0 %v123_v5  ;;  %v57_v5 = vsel %vm34_vm0, %v21_v3, 0  ;;  %v735_v3 = vld [vmem:[%s1438_s2 + $0x10] sm:$0xff] }
  0x23   :  { %v210_v1 = vsub.f32 %v1097_v44, %v209_v51  ;;  %v1144_v25 = vand.u32 4294901760, %v57_v5  ;;  %v155_v45 = vand.u32 4294901760, %v154_v36 }
  0x24   :  { %309 = vmatmul.f32.gmra.mxu3 %v967_v35 }
  0x25   :  { %277 = vmatmul.f32.gmra.mxu1 %v998_v53  ;;  %v211_v14 = vand.u32 4294901760, %v210_v1  ;;  %v1156_v37 = vsub.f32 %v57_v5, %v1144_v25  ;;  %v878_v1 = vmov 0  }
  0x26   :  { %875 = vset.pattern.permute.xlu0 %v878_v1  ;;  %876 = vset.pattern.permute.xlu1 %v878_v1 }
  0x27   :  { %196 = vmatmul.f32.gmra.mxu2 %v195_v31  ;;  %v1150_v31 = vsub.f32 %v81_v8, %v1138_v18  ;;  %v161_v46 = vand.u32 4294901760, %v1156_v37  ;;  %877 = vset.pattern.permute.xlu2 %v878_v1  ;;  %v734_v8 = vld [vmem:[%s1438_s2 + $0x8] sm:$0xff] }
  0x28   :  { %761 = vperm.xlu1 %876, %v735_v3  }
  0x29   :  { %v225_v43 = vand.u32 4294901760, %v1150_v31 }
  0x2a   :  { %132 = vmatmul.f32.gmra.mxu0 %v131_v38  ;;  %v219_v38 = vand.u32 4294901760, %v218_v26 }
  0x2b   :  { %v226_v47 = vsub.f32 %v1150_v31, %v225_v43 }
  0x2c   :  { %313 = vmatmul.f32.gmra.mxu3 %v1012_v62 }
  0x2d   :  { %281 = vmatmul.f32.gmra.mxu1 %v1027_v7  ;;  %v227_v56 = vand.u32 4294901760, %v226_v47 }
  0x2f   :  { %204 = vmatmul.f32.gmra.mxu2 %v203_v50  ;;  %v162_v50 = vsub.f32 %v1156_v37, %v161_v46 }
  0x31   :  { %v163_v57 = vand.u32 4294901760, %v162_v50 }
  0x32   :  { %140 = vmatmul.f32.gmra.mxu0 %v139_v60  ;;  %v733_v60 = vld [vmem:[%s1438_s2] sm:$0xff] }
  0x33   :  { %751 = vperm.xlu0 %875, %v733_v60  }
  0x34   :  { %317 = vmatmul.f32.gmra.mxu3 %v1052_v4 }
  0x35   :  { %285 = vmatmul.f32.gmra.mxu1 %v1063_v21 }
  0x37   :  { %212 = vmatmul.f32.gmra.mxu2 %v211_v14 }
  0x3a   :  { %148 = vmatmul.f32.gmra.mxu0 %v147_v22 }
  0x3b   :  { %756 = vperm.xlu0 %875, %v734_v8  }
  0x3c   :  { %321 = vmatmul.f32.gmra.mxu3 %v1082_v33 }
  0x3d   :  { %289 = vmatmul.f32.gmra.mxu1 %v1091_v40 }
  0x3f   :  { %220 = vmatmul.f32.gmra.mxu2 %v219_v38 }
  0x42   :  { %156 = vmatmul.f32.gmra.mxu0 %v155_v45 }
  0x44   :  { %325 = vmatmul.f32.gmra.mxu3 %v1110_v54 }
  0x45   :  { %293 = vmatmul.f32.gmra.mxu1 %v1119_v0 }
  0x47   :  { %228 = vmatmul.f32.gmra.mxu2 %v227_v56 }
  0x4a   :  { %164 = vmatmul.f32.gmra.mxu0 %v163_v57 }
  0x4c   :  { %329 = vmatmul.f32.gmra.mxu3 %v1138_v18 }
  0x4d   :  { %297 = vmatmul.f32.gmra.mxu1 %v1144_v25 }
  0x4f   :  { %359 = vmatmul.f32.vlgmr.msrb.gmra.mxu2 %v965_v34  ;;  %v739_v34 = vld [vmem:[%s1438_s2 + $0x30] sm:$0xff] }
  0x50   :  { %781 = vperm.xlu0 %875, %v739_v34  }
  0x52   :  { %584 = vmatmul.f32.vlgmr.msrb.gmra.mxu0 %v956_v28 }
  0x54   :  { %461 = vmatmul.f32.vlgmr.msrb.gmra.mxu3 %v105_v42  ;;  %v737_v42 = vld [vmem:[%s1438_s2 + $0x20] sm:$0xff] }
  0x55   :  { %669 = vmatmul.f32.vlgmr.msrb.gmra.mxu1 %v956_v28  ;;  %v736_v28 = vld [vmem:[%s1438_s2 + $0x18] sm:$0xff]  ;;  %771 = vperm.xlu2 %877, %v737_v42  }
  0x56   :  { %766 = vperm.xlu1 %876, %v736_v28  }
  0x57   :  { %364 = vmatmul.f32.gmra.mxu2 %v1001_v55  ;;  %v742_v55 = vld [vmem:[%s1438_s2 + $0x48] sm:$0xff] }
  0x58   :  { %796 = vperm.xlu0 %875, %v742_v55  }
  0x5a   :  { %588 = vmatmul.f32.gmra.mxu0 %v990_v49 }
  0x5c   :  { %467 = vmatmul.f32.gmra.mxu3 %v113_v58 }
  0x5d   :  { %673 = vmatmul.f32.gmra.mxu1 %v990_v49  ;;  %v740_v49 = vld [vmem:[%s1438_s2 + $0x38] sm:$0xff] }
  0x5e   :  { %786 = vperm.xlu1 %876, %v740_v49  }
  0x5f   :  { %369 = vmatmul.f32.gmra.mxu2 %v1009_v59 }
  0x62   :  { %592 = vmatmul.f32.gmra.mxu0 %v998_v53 }
  0x64   :  { %473 = vmatmul.f32.gmra.mxu3 %v121_v6 }
  0x65   :  { %677 = vmatmul.f32.gmra.mxu1 %v998_v53  ;;  %v738_v53 = vld [vmem:[%s1438_s2 + $0x28] sm:$0xff] }
  0x66   :  { %776 = vperm.xlu2 %877, %v738_v53  }
  0x67   :  { %374 = vmatmul.f32.gmra.mxu2 %v1048_v13 }
  0x6a   :  { %596 = vmatmul.f32.gmra.mxu0 %v1027_v7 }
  0x6c   :  { %479 = vmatmul.f32.gmra.mxu3 %v129_v20 }
  0x6d   :  { %681 = vmatmul.f32.gmra.mxu1 %v1027_v7  ;;  %v745_v7 = vld [vmem:[%s1438_s2 + $0x60] sm:$0xff] }
  0x6e   :  { %811 = vperm.xlu0 %875, %v745_v7   ;;  %791 = vperm.xlu2 %877, %v741_v11  }
  0x6f   :  { %379 = vmatmul.f32.gmra.mxu2 %v1079_v29 }
  0x72   :  { %600 = vmatmul.f32.gmra.mxu0 %v1063_v21 }
  0x74   :  { %485 = vmatmul.f32.gmra.mxu3 %v137_v39 }
  0x75   :  { %685 = vmatmul.f32.gmra.mxu1 %v1063_v21 }
  0x77   :  { %384 = vmatmul.f32.gmra.mxu2 %v1107_v48 }
  0x7a   :  { %604 = vmatmul.f32.gmra.mxu0 %v1091_v40 }
  0x7c   :  { %491 = vmatmul.f32.gmra.mxu3 %v145_v63 }
  0x7d   :  { %689 = vmatmul.f32.gmra.mxu1 %v1091_v40  ;;  %v743_v40 = vld [vmem:[%s1438_s2 + $0x50] sm:$0xff] }
  0x7e   :  { %801 = vperm.xlu1 %876, %v743_v40  }
  0x7f   :  { %389 = vmatmul.f32.gmra.mxu2 %v1135_v12 }
  0x82   :  { %608 = vmatmul.f32.gmra.mxu0 %v1119_v0 }
  0x84   :  { %497 = vmatmul.f32.gmra.mxu3 %v153_v9 }
  0x85   :  { %693 = vmatmul.f32.gmra.mxu1 %v1119_v0 }
  0x87   :  { %394 = vmatmul.f32.gmra.mxu2 %v1156_v37 }
  0x8a   :  { %612 = vmatmul.f32.gmra.mxu0 %v1144_v25 }
  0x8c   :  { %503 = vmatmul.f32.gmra.mxu3 %v161_v46 }
  0x8d   :  { %697 = vmatmul.f32.gmra.mxu1 %v1144_v25  ;;  %v744_v25 = vld [vmem:[%s1438_s2 + $0x58] sm:$0xff] }
  0x8e   :  { %806 = vperm.xlu2 %877, %v744_v25  }
  0x8f   :  { %399 = vmatmul.f32.gmra.mxu2 %v949_v23  ;;  %v1240_v58 = vpop.f32.mrf.mxu0 }
  0x92   :  { %v173_v59 = vpop.f32.mrf.mxu2  ;;  %v1242_v6 = vpop.f32.mrf.mxu1  ;;  %616 = vmatmul.f32.gmra.mxu0 %v935_v15 }
  0x93   :  { %v271_v57 = vadd.f32 %v1242_v6, %v1240_v58 }
  0x94   :  { %509 = vmatmul.f32.gmra.mxu3 %v169_v30 }
  0x95   :  { %701 = vmatmul.f32.gmra.mxu1 %v935_v15  ;;  %v748_v15 = vld [vmem:[%s1438_s2 + $0x78] sm:$0xff] }
  0x96   :  { %826 = vperm.xlu0 %875, %v748_v15  }
  0x97   :  { %404 = vmatmul.f32.gmra.mxu2 %v954_v27  ;;  %v302_v13 = vpop.f32.mrf.mxu3  ;;  %v1252_v20 = vpop.f32.mrf.mxu0 }
  0x98   :  { %v1254_v21 = vadd.f32 %v302_v13, %v173_v59 }
  0x9a   :  { %v181_v29 = vpop.f32.mrf.mxu2  ;;  %v1256_v39 = vpop.f32.mrf.mxu1  ;;  %620 = vmatmul.f32.gmra.mxu0 %v943_v19 }
  0x9c   :  { %515 = vmatmul.f32.gmra.mxu3 %v177_v41 }
  0x9d   :  { %705 = vmatmul.f32.gmra.mxu1 %v943_v19  ;;  %v746_v19 = vld [vmem:[%s1438_s2 + $0x68] sm:$0xff] }
  0x9e   :  { %816 = vperm.xlu1 %876, %v746_v19   ;;  %v762_v19 = vpop.permute.xlu1 %761 }
  0x9f   :  { %409 = vmatmul.f32.gmra.mxu2 %v996_v52  ;;  %v306_v23 = vpop.f32.mrf.mxu3  ;;  %v1269_v30 = vpop.f32.mrf.mxu0 }
  0xa0   :  { %v1271_v48 = vadd.f32 %v306_v23, %v181_v29 }
  0xa2   :  { %v189_v63 = vpop.f32.mrf.mxu2  ;;  %v1273_v0 = vpop.f32.mrf.mxu1  ;;  %624 = vmatmul.f32.gmra.mxu0 %v967_v35 }
  0xa3   :  { %v279_v40 = vadd.f32 %v1273_v0, %v1269_v30 }
  0xa4   :  { %521 = vmatmul.f32.gmra.mxu3 %v185_v61 }
  0xa5   :  { %709 = vmatmul.f32.gmra.mxu1 %v967_v35  ;;  %v752_v28 = vpop.permute.xlu0 %751 }
  0xa7   :  { %414 = vmatmul.f32.gmra.mxu2 %v1036_v10  ;;  %v310_v27 = vpop.f32.mrf.mxu3  ;;  %v1286_v41 = vpop.f32.mrf.mxu0 }
  0xa8   :  { %v1288_v12 = vadd.f32 %v310_v27, %v189_v63 }
  0xaa   :  { %v197_v14 = vpop.f32.mrf.mxu2  ;;  %v1290_v5 = vpop.f32.mrf.mxu1  ;;  %628 = vmatmul.f32.gmra.mxu0 %v1012_v62 }
  0xac   :  { %527 = vmatmul.f32.gmra.mxu3 %v193_v16 }
  0xad   :  { %713 = vmatmul.f32.gmra.mxu1 %v1012_v62  ;;  %v757_v29 = vpop.permute.xlu0 %756 }
  0xaf   :  { %419 = vmatmul.f32.gmra.mxu2 %v1069_v24  ;;  %v314_v35 = vpop.f32.mrf.mxu3  ;;  %v1297_v52 = vpop.f32.mrf.mxu0  ;;  %v747_v24 = vld [vmem:[%s1438_s2 + $0x70] sm:$0xff] }
  0xb0   :  { %v1299_v61 = vadd.f32 %v314_v35, %v197_v14  ;;  %821 = vperm.xlu2 %877, %v747_v24  }
  0xb2   :  { %v205_v22 = vpop.f32.mrf.mxu2  ;;  %v1301_v9 = vpop.f32.mrf.mxu1  ;;  %632 = vmatmul.f32.gmra.mxu0 %v1052_v4 }
  0xb4   :  { %533 = vmatmul.f32.gmra.mxu3 %v201_v32 }
  0xb5   :  { %717 = vmatmul.f32.gmra.mxu1 %v1052_v4 }
  0xb7   :  { %424 = vmatmul.f32.gmra.mxu2 %v1097_v44  ;;  %v318_v62 = vpop.f32.mrf.mxu3  ;;  %v1311_v10 = vpop.f32.mrf.mxu0 }
  0xb8   :  { %v1313_v16 = vadd.f32 %v318_v62, %v205_v22  ;;  %v283_v22 = vadd.f32 %v1290_v5, %v1286_v41 }
  0xba   :  { %v213_v26 = vpop.f32.mrf.mxu2  ;;  %v1315_v36 = vpop.f32.mrf.mxu1  ;;  %636 = vmatmul.f32.gmra.mxu0 %v1082_v33 }
  0xbc   :  { %539 = vmatmul.f32.gmra.mxu3 %v209_v51 }
  0xbd   :  { %721 = vmatmul.f32.gmra.mxu1 %v1082_v33 }
  0xbf   :  { %429 = vmatmul.f32.gmra.mxu2 %v1125_v2  ;;  %v322_v4 = vpop.f32.mrf.mxu3  ;;  %v1325_v32 = vpop.f32.mrf.mxu0 }
  0xc0   :  { %v1327_v37 = vadd.f32 %v322_v4, %v213_v26 }
  0xc2   :  { %v221_v38 = vpop.f32.mrf.mxu2  ;;  %v1329_v45 = vpop.f32.mrf.mxu1  ;;  %640 = vmatmul.f32.gmra.mxu0 %v1110_v54 }
  0xc4   :  { %545 = vmatmul.f32.gmra.mxu3 %v217_v17 }
  0xc5   :  { %725 = vmatmul.f32.gmra.mxu1 %v1110_v54 }
  0xc7   :  { %434 = vmatmul.f32.gmra.mxu2 %v1150_v31  ;;  %v326_v33 = vpop.f32.mrf.mxu3  ;;  %v1336_v44 = vpop.f32.mrf.mxu0 }
  0xc8   :  { %v1338_v51 = vadd.f32 %v326_v33, %v221_v38 }
  0xca   :  { %v229_v46 = vpop.f32.mrf.mxu2  ;;  %v1340_v47 = vpop.f32.mrf.mxu1  ;;  %644 = vmatmul.f32.gmra.mxu0 %v1138_v18 }
  0xcc   :  { %551 = vmatmul.f32.gmra.mxu3 %v225_v43 }
  0xcd   :  { %729 = vmatmul.f32.gmra.mxu1 %v1138_v18  ;;  %v275_v18 = vadd.f32 %v1256_v39, %v1252_v20 }
  0xcf   :  { %v330_v2 = vpop.f32.mrf.mxu3  ;;  %v585_v17 = vpop.f32.mrf.mxu0 }
  0xd0   :  { %v1346_v54 = vadd.f32 %v330_v2, %v229_v46  ;;  %v767_v46 = vpop.permute.xlu1 %766  ;;  %v287_v2 = vadd.f32 %v1301_v9, %v1297_v52 }
  0xd2   :  { %v360_v50 = vpop.f32.mrf.mxu2  ;;  %v670_v56 = vpop.f32.mrf.mxu1 }
  0xd3   :  { %v361_v60 = vadd.f32 %v360_v50, %v271_v57 }
  0xd7   :  { %v462_v1 = vpop.f32.mrf.mxu3  ;;  %v589_v8 = vpop.f32.mrf.mxu0 }
  0xd8   :  { %v463_v3 = vadd.f32 %v462_v1, %v361_v60  ;;  %v772_v60 = vpop.permute.xlu2 %771 }
  0xda   :  { %v365_v34 = vpop.f32.mrf.mxu2  ;;  %v586_v42 = vadd.f32 %v585_v17, %v463_v3  ;;  %v674_v31 = vpop.f32.mrf.mxu1 }
  0xdb   :  { %v366_v49 = vadd.f32 %v365_v34, %v275_v18 }
  0xdc   :  { %v671_v43 = vadd.f32 %v670_v56, %v586_v42 }
  0xde   :  { %v829_v53 = vmul.f32 %v752_v28, %v671_v43  ;;  %v291_v28 = vadd.f32 %v1315_v36, %v1311_v10 }
  0xdf   :  { %v468_v55 = vpop.f32.mrf.mxu3  ;;  %v593_v59 = vpop.f32.mrf.mxu0 }
  0xe0   :  { %846 = vst.msk [vmem:[%s1439_s3] sm:$0xff] %vm845_vm1, %v829_v53  ;;  %v469_v58 = vadd.f32 %v468_v55, %v366_v49  ;;  %v777_v55 = vpop.permute.xlu2 %776 }
  0xe2   :  { %v370_v6 = vpop.f32.mrf.mxu2  ;;  %v590_v7 = vadd.f32 %v589_v8, %v469_v58  ;;  %v678_v13 = vpop.f32.mrf.mxu1 }
  0xe3   :  { %v371_v39 = vadd.f32 %v370_v6, %v279_v40 }
  0xe4   :  { %v675_v20 = vadd.f32 %v674_v31, %v590_v7 }
  0xe6   :  { %v830_v15 = vmul.f32 %v757_v29, %v675_v20 }
  0xe7   :  { %v474_v23 = vpop.f32.mrf.mxu3  ;;  %v597_v63 = vpop.f32.mrf.mxu0 }
  0xe8   :  { %847 = vst.msk [vmem:[%s1439_s3 + $0x8] sm:$0xff] %vm845_vm1, %v830_v15  ;;  %v475_v11 = vadd.f32 %v474_v23, %v371_v39  ;;  %v782_v39 = vpop.permute.xlu0 %781  ;;  %v299_v15 = vadd.f32 %v1340_v47, %v1336_v44 }
  0xea   :  { %v375_v27 = vpop.f32.mrf.mxu2  ;;  %v594_v14 = vadd.f32 %v593_v59, %v475_v11  ;;  %v682_v35 = vpop.f32.mrf.mxu1  ;;  %v295_v59 = vadd.f32 %v1329_v45, %v1325_v32 }
  0xeb   :  { %v376_v30 = vadd.f32 %v375_v27, %v283_v22  ;;  %v787_v22 = vpop.permute.xlu1 %786 }
  0xec   :  { %v679_v25 = vadd.f32 %v678_v13, %v594_v14 }
  0xee   :  { %v831_v0 = vmul.f32 %v762_v19, %v679_v25 }
  0xef   :  { %v480_v62 = vpop.f32.mrf.mxu3  ;;  %v601_v26 = vpop.f32.mrf.mxu0 }
  0xf0   :  { %848 = vst.msk [vmem:[%s1439_s3 + $0x10] sm:$0xff] %vm845_vm1, %v831_v0  ;;  %v481_v24 = vadd.f32 %v480_v62, %v376_v30 }
  0xf2   :  { %v380_v4 = vpop.f32.mrf.mxu2  ;;  %v598_v38 = vadd.f32 %v597_v63, %v481_v24  ;;  %v686_v33 = vpop.f32.mrf.mxu1 }
  0xf3   :  { %v381_v41 = vadd.f32 %v380_v4, %v287_v2 }
  0xf4   :  { %v683_v17 = vadd.f32 %v682_v35, %v598_v38  ;;  %v792_v38 = vpop.permute.xlu2 %791 }
  0xf6   :  { %v832_v5 = vmul.f32 %v767_v46, %v683_v17 }
  0xf7   :  { %v486_v50 = vpop.f32.mrf.mxu3  ;;  %v605_v56 = vpop.f32.mrf.mxu0 }
  0xf8   :  { %849 = vst.msk [vmem:[%s1439_s3 + $0x18] sm:$0xff] %vm845_vm1, %v832_v5  ;;  %v487_v57 = vadd.f32 %v486_v50, %v381_v41 }
  0xfa   :  { %v385_v1 = vpop.f32.mrf.mxu2  ;;  %v602_v8 = vadd.f32 %v601_v26, %v487_v57  ;;  %v690_v3 = vpop.f32.mrf.mxu1 }
  0xfb   :  { %v386_v52 = vadd.f32 %v385_v1, %v291_v28 }
  0xfc   :  { %v687_v34 = vadd.f32 %v686_v33, %v602_v8 }
  0xfe   :  { %v833_v9 = vmul.f32 %v772_v60, %v687_v34  ;;  %v797_v60 = vpop.permute.xlu0 %796 }
  0xff   :  { %v492_v42 = vpop.f32.mrf.mxu3  ;;  %v609_v31 = vpop.f32.mrf.mxu0 }
 0x100   :  { %850 = vst.msk [vmem:[%s1439_s3 + $0x20] sm:$0xff] %vm845_vm1, %v833_v9  ;;  %v493_v18 = vadd.f32 %v492_v42, %v386_v52  ;;  %v802_v42 = vpop.permute.xlu1 %801 }
 0x102   :  { %v390_v43 = vpop.f32.mrf.mxu2  ;;  %v606_v49 = vadd.f32 %v605_v56, %v493_v18  ;;  %v694_v53 = vpop.f32.mrf.mxu1 }
 0x103   :  { %v391_v10 = vadd.f32 %v390_v43, %v295_v59 }
 0x104   :  { %v691_v58 = vadd.f32 %v690_v3, %v606_v49 }
 0x106   :  { %v834_v36 = vmul.f32 %v777_v55, %v691_v58 }
 0x107   :  { %v498_v6 = vpop.f32.mrf.mxu3  ;;  %v613_v7 = vpop.f32.mrf.mxu0 }
 0x108   :  { %851 = vst.msk [vmem:[%s1439_s3 + $0x28] sm:$0xff] %vm845_vm1, %v834_v36  ;;  %v499_v13 = vadd.f32 %v498_v6, %v391_v10  ;;  %v807_v36 = vpop.permute.xlu2 %806 }
 0x10a   :  { %v395_v29 = vpop.f32.mrf.mxu2  ;;  %v610_v40 = vadd.f32 %v609_v31, %v499_v13  ;;  %v698_v20 = vpop.f32.mrf.mxu1 }
 0x10b   :  { %v396_v32 = vadd.f32 %v395_v29, %v299_v15  ;;  %v812_v15 = vpop.permute.xlu0 %811 }
 0x10c   :  { %v695_v23 = vadd.f32 %v694_v53, %v610_v40 }
 0x10e   :  { %v835_v45 = vmul.f32 %v782_v39, %v695_v23 }
 0x10f   :  { %v504_v63 = vpop.f32.mrf.mxu3  ;;  %v617_v11 = vpop.f32.mrf.mxu0 }
 0x110   :  { %852 = vst.msk [vmem:[%s1439_s3 + $0x30] sm:$0xff] %vm845_vm1, %v835_v45  ;;  %v505_v19 = vadd.f32 %v504_v63, %v396_v32 }
 0x112   :  { %v400_v27 = vpop.f32.mrf.mxu2  ;;  %v614_v14 = vadd.f32 %v613_v7, %v505_v19  ;;  %v702_v35 = vpop.f32.mrf.mxu1 }
 0x113   :  { %v401_v30 = vadd.f32 %v400_v27, %v1254_v21 }
 0x114   :  { %v699_v25 = vadd.f32 %v698_v20, %v614_v14  ;;  %v817_v14 = vpop.permute.xlu1 %816 }
 0x116   :  { %v836_v0 = vmul.f32 %v787_v22, %v699_v25 }
 0x117   :  { %v510_v44 = vpop.f32.mrf.mxu3  ;;  %v621_v47 = vpop.f32.mrf.mxu0 }
 0x118   :  { %853 = vst.msk [vmem:[%s1439_s3 + $0x38] sm:$0xff] %vm845_vm1, %v836_v0  ;;  %v511_v62 = vadd.f32 %v510_v44, %v401_v30 }
 0x11a   :  { %v405_v26 = vpop.f32.mrf.mxu2  ;;  %v618_v24 = vadd.f32 %v617_v11, %v511_v62  ;;  %v706_v4 = vpop.f32.mrf.mxu1 }
 0x11b   :  { %v406_v46 = vadd.f32 %v405_v26, %v1271_v48  ;;  %v822_v26 = vpop.permute.xlu2 %821 }
 0x11c   :  { %v703_v33 = vadd.f32 %v702_v35, %v618_v24 }
 0x11e   :  { %v837_v2 = vmul.f32 %v792_v38, %v703_v33 }
 0x11f   :  { %v516_v17 = vpop.f32.mrf.mxu3  ;;  %v625_v41 = vpop.f32.mrf.mxu0 }
 0x120   :  { %854 = vst.msk [vmem:[%s1439_s3 + $0x40] sm:$0xff] %vm845_vm1, %v837_v2  ;;  %v517_v21 = vadd.f32 %v516_v17, %v406_v46 }
 0x122   :  { %v410_v5 = vpop.f32.mrf.mxu2  ;;  %v622_v50 = vadd.f32 %v621_v47, %v517_v21  ;;  %v710_v56 = vpop.f32.mrf.mxu1 }
 0x123   :  { %v411_v1 = vadd.f32 %v410_v5, %v1288_v12 }
 0x124   :  { %v707_v57 = vadd.f32 %v706_v4, %v622_v50 }
 0x126   :  { %v838_v8 = vmul.f32 %v797_v60, %v707_v57 }
 0x127   :  { %v522_v3 = vpop.f32.mrf.mxu3  ;;  %v629_v28 = vpop.f32.mrf.mxu0 }
 0x128   :  { %855 = vst.msk [vmem:[%s1439_s3 + $0x48] sm:$0xff] %vm845_vm1, %v838_v8  ;;  %v523_v48 = vadd.f32 %v522_v3, %v411_v1 }
 0x12a   :  { %v415_v34 = vpop.f32.mrf.mxu2  ;;  %v626_v52 = vadd.f32 %v625_v41, %v523_v48  ;;  %v714_v9 = vpop.f32.mrf.mxu1 }
 0x12b   :  { %v416_v18 = vadd.f32 %v415_v34, %v1299_v61  ;;  %v827_v41 = vpop.permute.xlu0 %826 }
 0x12c   :  { %v711_v31 = vadd.f32 %v710_v56, %v626_v52 }
 0x12e   :  { %v839_v43 = vmul.f32 %v802_v42, %v711_v31 }
 0x12f   :  { %v528_v49 = vpop.f32.mrf.mxu3  ;;  %v633_v53 = vpop.f32.mrf.mxu0 }
 0x130   :  { %856 = vst.msk [vmem:[%s1439_s3 + $0x50] sm:$0xff] %vm845_vm1, %v839_v43  ;;  %v529_v12 = vadd.f32 %v528_v49, %v416_v18 }
 0x132   :  { %v420_v55 = vpop.f32.mrf.mxu2  ;;  %v630_v59 = vadd.f32 %v629_v28, %v529_v12  ;;  %v718_v58 = vpop.f32.mrf.mxu1 }
 0x133   :  { %v421_v6 = vadd.f32 %v420_v55, %v1313_v16 }
 0x134   :  { %v715_v10 = vadd.f32 %v714_v9, %v630_v59 }
 0x136   :  { %v840_v7 = vmul.f32 %v807_v36, %v715_v10 }
 0x137   :  { %v534_v13 = vpop.f32.mrf.mxu3  ;;  %v637_v20 = vpop.f32.mrf.mxu0 }
 0x138   :  { %857 = vst.msk [vmem:[%s1439_s3 + $0x58] sm:$0xff] %vm845_vm1, %v840_v7  ;;  %v535_v61 = vadd.f32 %v534_v13, %v421_v6 }
 0x13a   :  { %v425_v29 = vpop.f32.mrf.mxu2  ;;  %v634_v40 = vadd.f32 %v633_v53, %v535_v61  ;;  %v722_v23 = vpop.f32.mrf.mxu1 }
 0x13b   :  { %v426_v32 = vadd.f32 %v425_v29, %v1327_v37 }
 0x13c   :  { %v719_v39 = vadd.f32 %v718_v58, %v634_v40 }
 0x13e   :  { %v841_v45 = vmul.f32 %v812_v15, %v719_v39 }
 0x13f   :  { %v540_v63 = vpop.f32.mrf.mxu3  ;;  %v641_v35 = vpop.f32.mrf.mxu0 }
 0x140   :  { %858 = vst.msk [vmem:[%s1439_s3 + $0x60] sm:$0xff] %vm845_vm1, %v841_v45  ;;  %v541_v16 = vadd.f32 %v540_v63, %v426_v32 }
 0x142   :  { %v430_v11 = vpop.f32.mrf.mxu2  ;;  %v638_v19 = vadd.f32 %v637_v20, %v541_v16  ;;  %v726_v0 = vpop.f32.mrf.mxu1 }
 0x143   :  { %v431_v22 = vadd.f32 %v430_v11, %v1338_v51 }
 0x144   :  { %v723_v27 = vadd.f32 %v722_v23, %v638_v19 }
 0x146   :  { %v842_v25 = vmul.f32 %v817_v14, %v723_v27 }
 0x147   :  { %v546_v30 = vpop.f32.mrf.mxu3  ;;  %v645_v33 = vpop.f32.mrf.mxu0 }
 0x148   :  { %859 = vst.msk [vmem:[%s1439_s3 + $0x68] sm:$0xff] %vm845_vm1, %v842_v25  ;;  %v547_v37 = vadd.f32 %v546_v30, %v431_v22 }
 0x14a   :  { %v642_v44 = vadd.f32 %v641_v35, %v547_v37  ;;  %v435_v47 = vpop.f32.mrf.mxu2  ;;  %v730_v46 = vpop.f32.mrf.mxu1 }
 0x14b   :  { %v436_v24 = vadd.f32 %v435_v47, %v1346_v54 }
 0x14c   :  { %v727_v62 = vadd.f32 %v726_v0, %v642_v44 }
 0x14e   :  { %v843_v4 = vmul.f32 %v822_v26, %v727_v62 }
 0x14f   :  { %v552_v38 = vpop.f32.mrf.mxu3 }
 0x150   :  { %860 = vst.msk [vmem:[%s1439_s3 + $0x70] sm:$0xff] %vm845_vm1, %v843_v4  ;;  %v553_v51 = vadd.f32 %v552_v38, %v436_v24 }
 0x152   :  { %v646_v2 = vadd.f32 %v645_v33, %v553_v51 }
 0x154   :  { %v731_v17 = vadd.f32 %v730_v46, %v646_v2 }
 0x156   :  { %v844_v21 = vmul.f32 %v827_v41, %v731_v17 }
 0x158   :  { %861 = vst.msk [vmem:[%s1439_s3 + $0x78] sm:$0xff] %vm845_vm1, %v844_v21 }

</bundles_post_ra>
